<compile_context>
chip_gen: v7x
topology: tpu7x:2x2x1
jax: 0.10.0
libtpu: 0.0.40
codegen_flags: <defaults>
</compile_context>

<pallas_src>
import functools
import math

import jax
import jax.numpy as jnp
from jax import lax
from jax.experimental import pallas as pl
from jax.experimental.pallas import tpu as pltpu


# =============================================================================
# LayerNorm_s  (the spec module): normalize over the channel axis.
# =============================================================================
def _ln_rows_kernel(x_ref, w_ref, b_ref, o_ref, *, eps):
    """Per-row LN over the channel axis; C lives on lanes (fallback path)."""
    x = x_ref[...].astype(jnp.float32)                            # (tr, C)
    mean = jnp.mean(x, axis=-1, keepdims=True)
    var = jnp.maximum(jnp.mean(x * x, axis=-1, keepdims=True) - mean * mean, 0.0)
    scale = lax.rsqrt(var + eps) * w_ref[...]
    o_ref[...] = ((x - mean) * scale + b_ref[...]).astype(o_ref.dtype)


def _ln_packed_kernel(x_ref, red_ref, bc_ref, w_ref, b_ref, o_ref, *, eps):
    """Lane-dense LN: G rows packed per lane-row (gc = G*C, multiple of 128).
    Segmented per-row reductions / broadcasts go through tiny block-diagonal
    matmuls on the MXU (idle otherwise)."""
    x = x_ref[...].astype(jnp.float32)                            # (tg, gc)
    red = red_ref[...]                                            # (gc, G) block-diag / C
    bc = bc_ref[...]                                              # (G, gc) block-diag ones
    mean = jnp.dot(x, red, preferred_element_type=jnp.float32)    # (tg, G)
    msq = jnp.dot(x * x, red, preferred_element_type=jnp.float32)
    var = jnp.maximum(msq - mean * mean, 0.0)
    scale = lax.rsqrt(var + eps)
    mean_b = jnp.dot(mean, bc, preferred_element_type=jnp.float32)   # (tg, gc)
    scale_b = jnp.dot(scale, bc, preferred_element_type=jnp.float32)
    o_ref[...] = ((x - mean_b) * (scale_b * w_ref[...]) + b_ref[...]).astype(o_ref.dtype)


def _row_tile(nrows, row_bytes, budget=1 << 20):
    """Row tile: multiple of 8 (or the full extent) sized to ~budget bytes per
    buffer.  Grid uses pl.cdiv, so the tile need not divide nrows."""
    if nrows <= 8:
        return nrows
    t = min(nrows, max(8, budget // max(row_bytes, 1)))
    return max(8, (t // 8) * 8)


def layer_norm_s(x, weight, bias, eps=1e-6, data_format="channels_last"):
    """Forward of LayerNorm_s.

    channels_last : F.layer_norm over the last dim (biased variance + affine).
    channels_first: normalize over dim 1 (handled by transposing; same math).
    Inputs stay in their original dtype in HBM; math is f32 inside the kernel.
    """
    if data_format not in ("channels_last", "channels_first"):
        raise NotImplementedError(data_format)

    if data_format == "channels_first":
        perm = (0,) + tuple(range(2, x.ndim)) + (1,)
        inv = [0] * x.ndim
        for i, p in enumerate(perm):
            inv[p] = i
        y = layer_norm_s(jnp.transpose(x, perm), weight, bias, eps, "channels_last")
        return jnp.transpose(y, inv)

    orig_shape, orig_dtype = x.shape, x.dtype
    C = x.shape[-1]
    rows = int(math.prod(x.shape[:-1]))
    x2 = x.reshape(rows, C)                                       # no dtype change
    dsize = jnp.dtype(orig_dtype).itemsize

    # ----- lane-dense packed path: fold G rows onto lanes (gc % 128 == 0) -----
    G = 128 // math.gcd(C, 128)
    if C < 128 and G > 1 and rows % G == 0:
        gc = G * C
        pr = rows // G
        xg = x2.reshape(pr, gc)                                   # free row-major reshape
        grp = jnp.arange(gc, dtype=jnp.int32) // C
        red = (grp[:, None] == jnp.arange(G)[None, :]).astype(jnp.float32) / C  # (gc, G)
        bc = (grp[None, :] == jnp.arange(G)[:, None]).astype(jnp.float32)       # (G, gc)
        wg = jnp.tile(weight.astype(jnp.float32), G).reshape(1, gc)
        bg = jnp.tile(bias.astype(jnp.float32), G).reshape(1, gc)
        tg = _row_tile(pr, gc * dsize)
        out = pl.pallas_call(
            functools.partial(_ln_packed_kernel, eps=eps),
            out_shape=jax.ShapeDtypeStruct((pr, gc), orig_dtype),
            grid=(pl.cdiv(pr, tg),),
            in_specs=[
                pl.BlockSpec((tg, gc), lambda i: (i, 0)),
                pl.BlockSpec((gc, G), lambda i: (0, 0)),
                pl.BlockSpec((G, gc), lambda i: (0, 0)),
                pl.BlockSpec((1, gc), lambda i: (0, 0)),
                pl.BlockSpec((1, gc), lambda i: (0, 0)),
            ],
            out_specs=pl.BlockSpec((tg, gc), lambda i: (i, 0)),
            compiler_params=pltpu.CompilerParams(dimension_semantics=("parallel",)),
        )(xg, red, bc, wg, bg)
        return out.reshape(orig_shape)

    # ----- fallback: C on lanes, cdiv grid with partial last block -----
    tr = _row_tile(rows, C * dsize)
    w32 = weight.reshape(1, C).astype(jnp.float32)
    b32 = bias.reshape(1, C).astype(jnp.float32)
    out = pl.pallas_call(
        functools.partial(_ln_rows_kernel, eps=eps),
        out_shape=jax.ShapeDtypeStruct((rows, C), orig_dtype),
        grid=(pl.cdiv(rows, tr),),
        in_specs=[
            pl.BlockSpec((tr, C), lambda i: (i, 0)),
            pl.BlockSpec((1, C), lambda i: (0, 0)),
            pl.BlockSpec((1, C), lambda i: (0, 0)),
        ],
        out_specs=pl.BlockSpec((tr, C), lambda i: (i, 0)),
        compiler_params=pltpu.CompilerParams(dimension_semantics=("parallel",)),
    )(x2, w32, b32)
    return out.reshape(orig_shape)


# =============================================================================
# Fused ConvNeXt block (LayerNorm_s is its `norm` stage).
# =============================================================================
def _gelu_tanh(x):
    # tanh-form GELU: ~6 VALU + 1 EUP ops per element (vs ~14 for A&S erf);
    # max abs deviation from exact erf-GELU is ~3e-4.
    c0 = 0.7978845608028654  # sqrt(2/pi)
    return 0.5 * x * (1.0 + jnp.tanh(c0 * (x + 0.044715 * x * x * x)))


@functools.lru_cache(maxsize=None)
def _sublane_roll_ok(shape):
    """Probe: pltpu.roll along axis=1 of a 3-D f32 array compiles and matches
    jnp.roll semantics on this backend/shape.  Falls back to slices if not."""
    try:
        x = jax.random.normal(jax.random.PRNGKey(17), shape, jnp.float32)
        shift = shape[1] - 2

        def k(x_ref, o_ref):
            o_ref[...] = pltpu.roll(x_ref[...], shift=shift, axis=1)

        y = pl.pallas_call(k, out_shape=jax.ShapeDtypeStruct(shape, jnp.float32))(x)
        return bool(jnp.allclose(y, jnp.roll(x, shift, axis=1)))
    except Exception:
        return False


def convnext_block_kernel(xpad_ref, dww_ref, dwb_ref, w1_ref, b1_ref, w2_ref,
                          b2_ref, out_ref, *, tm, W, wp, C, eps, matmul_dtype,
                          use_roll):
    r = pl.program_id(1)
    row0 = pl.multiple_of(r * tm, tm)

    # One read of the (tm+6, wp, C) band (tm output rows + 7x7 halo); the HBM
    # stream stays in the input dtype, up-cast happens here.
    band = xpad_ref[0, pl.ds(row0, tm + 6)].astype(jnp.float32)
    dww = dww_ref[...]                                            # (49, C) f32

    # ----- depthwise 7x7 -----
    # Column taps: one pltpu.roll per j (XLU slot) + an aligned [:W] slice
    # instead of 7 non-8-aligned sublane slices.
    cols = []
    for j in range(7):
        if j == 0:
            cols.append(band[:, :W, :])
        elif use_roll:
            cols.append(pltpu.roll(band, shift=wp - j, axis=1)[:, :W, :])
        else:
            cols.append(band[:, j:j + W, :])                      # validated fallback

    # 49 taps; 4 independent accumulators break the dependent add chain.
    # TODO(synk): chunk rows with lax.fori_loop for very large tiles so the
    # accumulators stay vreg-resident instead of spilling to VMEM.
    n_acc = 4
    accs = [jnp.zeros((tm, W, C), jnp.float32) for _ in range(n_acc)]
    for j in range(7):
        cj = cols[j]
        for i in range(7):
            k = (i + j) % n_acc
            accs[k] = accs[k] + cj[i:i + tm] * dww[i * 7 + j]
    acc = (accs[0] + accs[1]) + (accs[2] + accs[3])
    acc = acc + dwb_ref[...]

    # ----- LayerNorm_s over channels: single pass, affine folded into w1/b1 -----
    y = acc.reshape(tm * W, C)                                    # free when W % 8 == 0
    mean = jnp.mean(y, axis=-1, keepdims=True)
    var = jnp.maximum(jnp.mean(y * y, axis=-1, keepdims=True) - mean * mean, 0.0)
    y = (y - mean) * lax.rsqrt(var + eps)

    # ----- pwconv1 -> GELU(tanh) -> pwconv2 on the MXU (bf16 in, f32 acc);
    # layer-scale gamma folded into w2/b2. -----
    h = jnp.dot(y.astype(matmul_dtype), w1_ref[...],
                preferred_element_type=jnp.float32) + b1_ref[...]
    h = _gelu_tanh(h)
    z = jnp.dot(h.astype(matmul_dtype), w2_ref[...],
                preferred_element_type=jnp.float32) + b2_ref[...]

    # ----- residual from the interior of the already-loaded band -----
    res = cols[3][3:3 + tm].reshape(tm * W, C)
    out_ref[0] = (res + z).reshape(tm, W, C).astype(out_ref.dtype)


def _pick_block_rows(H, W, C4, requested=None, budget=4 * 1024 * 1024):
    if requested is not None and H % int(requested) == 0:
        return int(requested)
    cands = [t for t in range(8, H + 1, 8) if H % t == 0]
    if not cands:
        return H
    fitting = [t for t in cands if t * W * C4 * 4 <= budget]
    return max(fitting) if fitting else min(cands)


def convnext_block(x_nchw, params, eps=1e-6, block_rows=None,
                   matmul_dtype=jnp.bfloat16):
    """ConvNeXt block forward; x_nchw: (N, C, H, W) -> (N, C, H, W).

    matmul_dtype=bfloat16 uses the native MXU path on all generations (VPU math
    stays f32, which v5e requires); pass jnp.float32 for bit-tighter results.
    DropPath = identity (eval / drop_prob=0).
    """
    N, C, H, W = x_nchw.shape
    C4 = 4 * C
    Hp = H + 6
    wp = ((W + 6 + 7) // 8) * 8          # halo'd width padded to a multiple of 8
    tm = _pick_block_rows(H, W, C4, block_rows)
    use_roll = _sublane_roll_ok((tm + 6, wp, C))

    # NCHW -> NHWC + halo pad in the INPUT dtype (no f32 up-cast in HBM).
    # TODO(synk): fold the halo into the kernel (boundary masking) and accept
    # NHWC directly to drop this extra HBM round trip.
    x = jnp.transpose(x_nchw, (0, 2, 3, 1))
    xpad = jnp.pad(x, ((0, 0), (3, 3), (3, wp - W - 3), (0, 0)))

    f32 = jnp.float32
    dww = jnp.transpose(params["dw_w"][:, 0], (1, 2, 0)).reshape(49, C).astype(f32)
    dwb = params["dw_b"].reshape(1, C).astype(f32)
    w1 = jnp.transpose(params["w1"]).astype(f32)                  # (C, 4C)
    w2 = jnp.transpose(params["w2"]).astype(f32)                  # (4C, C)
    w1f = (params["ln_w"].astype(f32)[:, None] * w1).astype(matmul_dtype)
    b1f = (params["ln_b"].astype(f32) @ w1 + params["b1"].astype(f32)).reshape(1, C4)
    w2f = (w2 * params["gamma"].astype(f32)[None, :]).astype(matmul_dtype)
    b2f = (params["b2"].astype(f32) * params["gamma"].astype(f32)).reshape(1, C)

    kernel = functools.partial(convnext_block_kernel, tm=tm, W=W, wp=wp, C=C,
                               eps=eps, matmul_dtype=matmul_dtype,
                               use_roll=use_roll)

    def _full(shape):
        nd = len(shape)
        return pl.BlockSpec(shape, lambda n, r, _nd=nd: (0,) * _nd)

    out_nhwc = pl.pallas_call(
        kernel,
        out_shape=jax.ShapeDtypeStruct((N, H, W, C), x_nchw.dtype),
        grid=(N, H // tm),
        in_specs=[
            # Padded image: one block per batch element, resident across all
            # row tiles (also supplies the residual interior).
            pl.BlockSpec((1, Hp, wp, C), lambda n, r: (n, 0, 0, 0)),
            _full((49, C)),      # depthwise weights
            _full((1, C)),       # depthwise bias
            _full((C, C4)),      # pwconv1 weight (LN scale folded in)
            _full((1, C4)),      # pwconv1 bias   (LN bias folded in)
            _full((C4, C)),      # pwconv2 weight (gamma folded in)
            _full((1, C)),       # pwconv2 bias   (gamma folded in)
        ],
        out_specs=pl.BlockSpec((1, tm, W, C), lambda n, r: (n, r, 0, 0)),
        compiler_params=pltpu.CompilerParams(
            dimension_semantics=("parallel", "parallel"),   # row tiles independent
            vmem_limit_bytes=32 * 1024 * 1024),
    )(xpad, dww, dwb, w1f, b1f, w2f, b2f)

    return jnp.transpose(out_nhwc, (0, 3, 1, 2))


# =============================================================================
# Pure-JAX references (mirror the PyTorch forward passes).
# =============================================================================
def layer_norm_s_ref(x, weight, bias, eps=1e-6, data_format="channels_last"):
    if data_format == "channels_last":
        mean = x.mean(-1, keepdims=True)
        var = ((x - mean) ** 2).mean(-1, keepdims=True)
        return (x - mean) / jnp.sqrt(var + eps) * weight + bias
    u = x.mean(1, keepdims=True)
    s = ((x - u) ** 2).mean(1, keepdims=True)
    xn = (x - u) / jnp.sqrt(s + eps)
    shape = (1, -1) + (1,) * (x.ndim - 2)
    return weight.reshape(shape) * xn + bias.reshape(shape)


def convnext_block_ref(x_nchw, params, eps=1e-6):
    C = x_nchw.shape[1]
    y = lax.conv_general_dilated(
        x_nchw.astype(jnp.float32), params["dw_w"].astype(jnp.float32),
        window_strides=(1, 1), padding=((3, 3), (3, 3)), feature_group_count=C,
        dimension_numbers=("NCHW", "OIHW", "NCHW"))
    y = y + params["dw_b"][None, :, None, None]
    y = jnp.transpose(y, (0, 2, 3, 1))
    mean = y.mean(-1, keepdims=True)
    var = ((y - mean) ** 2).mean(-1, keepdims=True)
    y = (y - mean) / jnp.sqrt(var + eps)
    y = y * params["ln_w"] + params["ln_b"]
    y = y @ params["w1"].T + params["b1"]
    y = jax.nn.gelu(y, approximate=False)          # PyTorch nn.GELU() (erf form)
    y = y @ params["w2"].T + params["b2"]
    y = params["gamma"] * y
    return x_nchw + jnp.transpose(y, (0, 3, 1, 2))


if __name__ == "__main__":
    key = jax.random.PRNGKey(0)
    ks = jax.random.split(key, 12)

    N, C, H, W = 2, 4, 16, 16

    # ---------------- LayerNorm_s (the spec module) ----------------
    ln_w = 1.0 + 0.1 * jax.random.normal(ks[0], (C,), jnp.float32)
    ln_b = 0.1 * jax.random.normal(ks[1], (C,), jnp.float32)

    # channels_last (lane-dense packed path: C=4 -> 32 rows folded onto lanes)
    x_cl = jax.random.normal(ks[2], (N, H, W, C), jnp.float32)
    y_cl = jax.block_until_ready(layer_norm_s(x_cl, ln_w, ln_b, 1e-6, "channels_last"))
    ref_cl = layer_norm_s_ref(x_cl, ln_w, ln_b, 1e-6, "channels_last")
    assert y_cl.shape == x_cl.shape and y_cl.dtype == x_cl.dtype
    assert jnp.allclose(y_cl, ref_cl, atol=1e-4, rtol=1e-4), \
        float(jnp.max(jnp.abs(y_cl - ref_cl)))

    # channels_first
    x_cf = jnp.transpose(x_cl, (0, 3, 1, 2))
    y_cf = jax.block_until_ready(layer_norm_s(x_cf, ln_w, ln_b, 1e-6, "channels_first"))
    ref_cf = layer_norm_s_ref(x_cf, ln_w, ln_b, 1e-6, "channels_first")
    assert y_cf.shape == x_cf.shape
    assert jnp.allclose(y_cf, ref_cf, atol=1e-4, rtol=1e-4), \
        float(jnp.max(jnp.abs(y_cf - ref_cf)))

    # bf16 in -> bf16 out (dtype-preserving HBM streams, f32 math inside)
    x_bf = x_cl.astype(jnp.bfloat16)
    y_bf = jax.block_until_ready(layer_norm_s(x_bf, ln_w, ln_b, 1e-6, "channels_last"))
    assert y_bf.dtype == jnp.bfloat16
    ref_bf = layer_norm_s_ref(x_bf.astype(jnp.float32), ln_w, ln_b, 1e-6, "channels_last")
    assert jnp.allclose(y_bf.astype(jnp.float32), ref_bf, atol=3e-2, rtol=3e-2), \
        float(jnp.max(jnp.abs(y_bf.astype(jnp.float32) - ref_bf)))

    # awkward shape: fallback path + cdiv grid with a partial last block
    x_odd = jax.random.normal(ks[11], (3, 7, 5), jnp.float32)
    w_odd = 1.0 + 0.1 * jax.random.normal(ks[0], (5,), jnp.float32)
    b_odd = 0.1 * jax.random.normal(ks[1], (5,), jnp.float32)
    y_odd = jax.block_until_ready(layer_norm_s(x_odd, w_odd, b_odd))
    ref_odd = layer_norm_s_ref(x_odd, w_odd, b_odd)
    assert jnp.allclose(y_odd, ref_odd, atol=1e-4, rtol=1e-4), \
        float(jnp.max(jnp.abs(y_odd - ref_odd)))

    # ---------------- fused ConvNeXt block ----------------
    x = jax.random.normal(ks[3], (N, C, H, W), jnp.float32)
    params = {
        "dw_w": 0.1 * jax.random.normal(ks[4], (C, 1, 7, 7), jnp.float32),   # dwconv.weight
        "dw_b": 0.1 * jax.random.normal(ks[5], (C,), jnp.float32),           # dwconv.bias
        "ln_w": ln_w,                                                        # norm.weight
        "ln_b": ln_b,                                                        # norm.bias
        "w1":   0.1 * jax.random.normal(ks[6], (4 * C, C), jnp.float32),     # pwconv1.weight
        "b1":   0.1 * jax.random.normal(ks[7], (4 * C,), jnp.float32),       # pwconv1.bias
        "w2":   0.1 * jax.random.normal(ks[8], (C, 4 * C), jnp.float32),     # pwconv2.weight
        "b2":   0.1 * jax.random.normal(ks[9], (C,), jnp.float32),           # pwconv2.bias
        "gamma": 0.1 * jax.random.normal(ks[10], (C,), jnp.float32),         # layer scale
    }

    # block_rows=8 -> grid=(2, 2): exercises the row-tiled / halo / roll path.
    out = jax.block_until_ready(convnext_block(x, params, block_rows=8))
    ref = convnext_block_ref(x, params)
    assert out.shape == x.shape and out.dtype == x.dtype
    # Tolerance covers bf16 MXU matmuls + tanh-form GELU vs the f32/erf ref.
    assert jnp.allclose(out, ref, atol=5e-3, rtol=5e-3), \
        float(jnp.max(jnp.abs(out - ref)))

    print("KERNEL_OK")
</pallas_src>

<mosaic_0001>
module attributes {stable_mosaic.version = 11 : i64} {
  func.func @_ln_packed_kernel(%arg0: i32, %arg1: memref<16x128xf32, #tpu.memory_space<vmem>>, %arg2: memref<128x32xf32, #tpu.memory_space<vmem>>, %arg3: memref<32x128xf32, #tpu.memory_space<vmem>>, %arg4: memref<1x128xf32, #tpu.memory_space<vmem>>, %arg5: memref<1x128xf32, #tpu.memory_space<vmem>>, %arg6: memref<16x128xf32, #tpu.memory_space<vmem>>) attributes {dimension_semantics = [#tpu.dimension_semantics<parallel>], iteration_bounds = array<i64: 1>, scalar_prefetch = 0 : i64, scratch_operands = 0 : i64, tpu.core_type = #tpu.core_type<tc>, window_params = [{transform_indices = @transform_0, window_bounds = array<i64: 16, 128>}, {pipeline_mode = #tpu.pipeline_mode<synchronous>, transform_indices = @transform_1, window_bounds = array<i64: 128, 32>}, {pipeline_mode = #tpu.pipeline_mode<synchronous>, transform_indices = @transform_2, window_bounds = array<i64: 32, 128>}, {pipeline_mode = #tpu.pipeline_mode<synchronous>, transform_indices = @transform_3, window_bounds = array<i64: 1, 128>}, {pipeline_mode = #tpu.pipeline_mode<synchronous>, transform_indices = @transform_4, window_bounds = array<i64: 1, 128>}, {transform_indices = @transform_5, window_bounds = array<i64: 16, 128>}]} {
    %c0 = arith.constant 0 : index
    %c0_0 = arith.constant 0 : index
    %0 = vector.load %arg1[%c0, %c0_0] : memref<16x128xf32, #tpu.memory_space<vmem>>, vector<16x128xf32>
    %c0_1 = arith.constant 0 : index
    %c0_2 = arith.constant 0 : index
    %1 = vector.load %arg2[%c0_1, %c0_2] : memref<128x32xf32, #tpu.memory_space<vmem>>, vector<128x32xf32>
    %c0_3 = arith.constant 0 : index
    %c0_4 = arith.constant 0 : index
    %2 = vector.load %arg3[%c0_3, %c0_4] : memref<32x128xf32, #tpu.memory_space<vmem>>, vector<32x128xf32>
    %cst = arith.constant dense<0.000000e+00> : vector<16x32xf32>
    %3 = tpu.matmul %0, %1, %cst {dimension_numbers = #tpu.dot_dimension_numbers<[1], [0], [0], [1], [0, 0, 1, 1], [], []>} : vector<16x128xf32>, vector<128x32xf32>, vector<16x32xf32> -> vector<16x32xf32>
    %4 = arith.mulf %0, %0 : vector<16x128xf32>
    %cst_5 = arith.constant dense<0.000000e+00> : vector<16x32xf32>
    %5 = tpu.matmul %4, %1, %cst_5 {dimension_numbers = #tpu.dot_dimension_numbers<[1], [0], [0], [1], [0, 0, 1, 1], [], []>} : vector<16x128xf32>, vector<128x32xf32>, vector<16x32xf32> -> vector<16x32xf32>
    %6 = arith.mulf %3, %3 : vector<16x32xf32>
    %7 = arith.subf %5, %6 : vector<16x32xf32>
    %cst_6 = arith.constant 0.000000e+00 : f32
    %8 = vector.broadcast %cst_6 : f32 to vector<16x32xf32>
    %9 = arith.maximumf %7, %8 : vector<16x32xf32>
    %cst_7 = arith.constant 9.99999997E-7 : f32
    %10 = vector.broadcast %cst_7 : f32 to vector<16x32xf32>
    %11 = arith.addf %9, %10 : vector<16x32xf32>
    %12 = math.rsqrt %11 : vector<16x32xf32>
    %cst_8 = arith.constant dense<0.000000e+00> : vector<16x128xf32>
    %13 = tpu.matmul %3, %2, %cst_8 {dimension_numbers = #tpu.dot_dimension_numbers<[1], [0], [0], [1], [0, 0, 1, 1], [], []>} : vector<16x32xf32>, vector<32x128xf32>, vector<16x128xf32> -> vector<16x128xf32>
    %cst_9 = arith.constant dense<0.000000e+00> : vector<16x128xf32>
    %14 = tpu.matmul %12, %2, %cst_9 {dimension_numbers = #tpu.dot_dimension_numbers<[1], [0], [0], [1], [0, 0, 1, 1], [], []>} : vector<16x32xf32>, vector<32x128xf32>, vector<16x128xf32> -> vector<16x128xf32>
    %15 = arith.subf %0, %13 : vector<16x128xf32>
    %c0_10 = arith.constant 0 : index
    %c0_11 = arith.constant 0 : index
    %16 = vector.load %arg4[%c0_10, %c0_11] : memref<1x128xf32, #tpu.memory_space<vmem>>, vector<1x128xf32>
    %17 = vector.broadcast %16 : vector<1x128xf32> to vector<16x128xf32>
    %18 = arith.mulf %14, %17 : vector<16x128xf32>
    %19 = arith.mulf %15, %18 : vector<16x128xf32>
    %c0_12 = arith.constant 0 : index
    %c0_13 = arith.constant 0 : index
    %20 = vector.load %arg5[%c0_12, %c0_13] : memref<1x128xf32, #tpu.memory_space<vmem>>, vector<1x128xf32>
    %21 = vector.broadcast %20 : vector<1x128xf32> to vector<16x128xf32>
    %22 = arith.addf %19, %21 : vector<16x128xf32>
    %c0_14 = arith.constant 0 : index
    %c0_15 = arith.constant 0 : index
    %23 = vector.load %arg6[%c0_14, %c0_15] : memref<16x128xf32, #tpu.memory_space<vmem>>, vector<16x128xf32>
    tpu.vector_store %arg6[%c0_14, %c0_15], %22 {strides = array<i32>} : memref<16x128xf32, #tpu.memory_space<vmem>>, vector<16x128xf32>,
    return
  }
  func.func @transform_0(%arg0: i32) -> (i32, i32) {
    %c0_i32 = arith.constant 0 : i32
    %c0_i32_0 = arith.constant 0 : i32
    return %arg0, %c0_i32 : i32, i32
  }
  func.func @transform_1(%arg0: i32) -> (i32, i32) {
    %c0_i32 = arith.constant 0 : i32
    %c0_i32_0 = arith.constant 0 : i32
    %c0_i32_1 = arith.constant 0 : i32
    return %c0_i32, %c0_i32_0 : i32, i32
  }
  func.func @transform_2(%arg0: i32) -> (i32, i32) {
    %c0_i32 = arith.constant 0 : i32
    %c0_i32_0 = arith.constant 0 : i32
    %c0_i32_1 = arith.constant 0 : i32
    return %c0_i32, %c0_i32_0 : i32, i32
  }
  func.func @transform_3(%arg0: i32) -> (i32, i32) {
    %c0_i32 = arith.constant 0 : i32
    %c0_i32_0 = arith.constant 0 : i32
    %c0_i32_1 = arith.constant 0 : i32
    return %c0_i32, %c0_i32_0 : i32, i32
  }
  func.func @transform_4(%arg0: i32) -> (i32, i32) {
    %c0_i32 = arith.constant 0 : i32
    %c0_i32_0 = arith.constant 0 : i32
    %c0_i32_1 = arith.constant 0 : i32
    return %c0_i32, %c0_i32_0 : i32, i32
  }
  func.func @transform_5(%arg0: i32) -> (i32, i32) {
    %c0_i32 = arith.constant 0 : i32
    %c0_i32_0 = arith.constant 0 : i32
    return %arg0, %c0_i32 : i32, i32
  }
}

</mosaic_0001>

<bundles_post_ra>
// kernel: tpu_custom_call.1
= control target key start
LH: loop header
LB: loop body
LE: loop exit
PB: predicated region body
PF: predicated region fallthrough
CT: control target
= control target key end

     0   :  { %s792_s0 = inlined_call_operand.vmem [shape: f32[16,128], index: 0, kind: input, shape index: {}]   ;;  %s793_s1 = inlined_call_operand.vmem [shape: f32[128,32], index: 1, kind: input, shape index: {}]   ;;  %s794_s2 = inlined_call_operand.vmem [shape: f32[32,128], index: 2, kind: input, shape index: {}]   ;;  %s795_s3 = inlined_call_operand.vmem [shape: f32[1,128], index: 3, kind: input, shape index: {}]   ;;  %s796_s4 = inlined_call_operand.vmem [shape: f32[1,128], index: 4, kind: input, shape index: {}]   ;;  %s797_s5 = inlined_call_operand.hbm [shape: f32[16,128], index: 5, kind: output, shape index: {}]  }
   0x1   :  { %v23_v0 = vld [vmem:[%s793_s1] sm:$0xff]  ;;  %v24_v1 = vld [vmem:[%s793_s1 + $0x8] sm:$0xff]  ;;  %v25_v2 = vld [vmem:[%s793_s1 + $0x10] sm:$0xff] }
   0x2   :  { %v554_v3 = vpack.c.bf16 %v24_v1, %v23_v0  ;;  %v26_v4 = vld [vmem:[%s793_s1 + $0x18] sm:$0xff]  ;;  %v27_v6 = vld [vmem:[%s793_s1 + $0x20] sm:$0xff]  ;;  %v28_v7 = vld [vmem:[%s793_s1 + $0x28] sm:$0xff] }
   0x3   :  { %v558_v5 = vpack.c.bf16 %v26_v4, %v25_v2  ;;  %v562_v8 = vpack.c.bf16 %v28_v7, %v27_v6  ;;  %v719_v9 = vld [vmem:[%s792_s0] sm:$0xff]  ;;  %v29_v10 = vld [vmem:[%s793_s1 + $0x30] sm:$0xff]  ;;  %v30_v11 = vld [vmem:[%s793_s1 + $0x38] sm:$0xff] }
   0x4   :  { %555 = vmatprep.subr.bf16.mxu0 %v554_v3  ;;  %587 = vmatprep.subr.bf16.mxu1 %v554_v3  ;;  %v118_v12 = vmul.f32 %v719_v9, %v719_v9 }
   0x5   :  { %557 = vmatpush3.bf16.msra.mxu0 %v554_v3  ;;  %589 = vmatpush3.bf16.msra.mxu1 %v554_v3 }
   0x6   :  { %559 = vmatprep.subr.bf16.mxu0 %v558_v5  ;;  %591 = vmatprep.subr.bf16.mxu1 %v558_v5 }
   0x7   :  { %494 = vmatprep.mubr.f32.mxu0 %v719_v9 }
   0x8   :  { %10 = vsyncpa [#allocation3], 0  ;;  %v566_v13 = vpack.c.bf16 %v30_v11, %v29_v10  ;;  %v31_v14 = vld [vmem:[%s793_s1 + $0x40] sm:$0xff]  ;;  %v32_v15 = vld [vmem:[%s793_s1 + $0x48] sm:$0xff]  ;;  %529 = vmatprep.mubr.f32.mxu1 %v118_v12  ;;  %vm205_vm0 = vcmask 261120   ;;  %s665_s13 = smov [#allocation2]  }
   0x9   :  { %561 = vmatpush3.bf16.msra.mxu0 %v558_v5  ;;  %593 = vmatpush3.bf16.msra.mxu1 %v558_v5  ;;  %v570_v16 = vpack.c.bf16 %v32_v15, %v31_v14  ;;  %v33_v17 = vld [vmem:[%s793_s1 + $0x50] sm:$0xff]  ;;  %v34_v18 = vld [vmem:[%s793_s1 + $0x58] sm:$0xff]  ;;  %v35_v20 = vld [vmem:[%s793_s1 + $0x60] sm:$0xff]  ;;  %s397_s14 = sshll.u32 %s665_s13, 4  ;;  %s398_s14 = int_to_ptr.vmem [resolvable:$true] %s397_s14 }
   0xa   :  { %563 = vmatprep.subr.bf16.mxu0 %v562_v8  ;;  %595 = vmatprep.subr.bf16.mxu1 %v562_v8  ;;  %v574_v19 = vpack.c.bf16 %v34_v18, %v33_v17  ;;  %v36_v21 = vld [vmem:[%s793_s1 + $0x68] sm:$0xff]  ;;  %v37_v23 = vld [vmem:[%s793_s1 + $0x70] sm:$0xff]  ;;  %v38_v24 = vld [vmem:[%s793_s1 + $0x78] sm:$0xff]  ;;  %p646_p1 = scmp.lt.s32.totalorder %s398_s14, %s398_s14 }
   0xb   :  { %v578_v22 = vpack.c.bf16 %v36_v21, %v35_v20  ;;  %v582_v25 = vpack.c.bf16 %v38_v24, %v37_v23  ;;  %v39_v26 = vld [vmem:[%s794_s2] sm:$0xff]  ;;  %v40_v27 = vld [vmem:[%s794_s2 + $0x8] sm:$0xff]  ;;  %v41_v30 = vld [vmem:[%s794_s2 + $0x10] sm:$0xff] }
   0xc   :  { %v22_v28 = vld [vmem:[%s792_s0 + $0x8] sm:$0xff]  ;;  %v618_v29 = vpack.c.bf16 %v40_v27, %v39_v26  ;;  %v42_v31 = vld [vmem:[%s794_s2 + $0x18] sm:$0xff]  ;;  %v412_v50 = vld [vmem:[%s795_s3] ss:$0 sm:$0xff]  ;;  %s641_s3 = scalar_lea.vmem %s398_s14, 256 }
   0xd   :  { %565 = vmatpush3.bf16.msra.mxu0 %v562_v8  ;;  %597 = vmatpush3.bf16.msra.mxu1 %v562_v8  ;;  %v119_v32 = vmul.f32 %v22_v28, %v22_v28  ;;  %v622_v33 = vpack.c.bf16 %v42_v31, %v41_v30  ;;  %v413_v56 = vld [vmem:[%s796_s4] ss:$0 sm:$0xff]  ;;  %p642_p0 = scmp.ne.s32.totalorder %s398_s14, %s641_s3  ;;  %p647_p2 = scmp.lt.s32.totalorder %s641_s3, %s641_s3 }
   0xe   :  { %567 = vmatprep.subr.bf16.mxu0 %v566_v13  ;;  %599 = vmatprep.subr.bf16.mxu1 %v566_v13 }
   0xf   :  { %p648_p3 = por %p647_p2, %p646_p1 }
  0x11   :  { %569 = vmatpush3.bf16.msra.mxu0 %v566_v13  ;;  %601 = vmatpush3.bf16.msra.mxu1 %v566_v13  ;;  %p649_p4 = pnand %p648_p3, %p642_p0 }
  0x12   :  { %571 = vmatprep.subr.bf16.mxu0 %v570_v16  ;;  %603 = vmatprep.subr.bf16.mxu1 %v570_v16 }
  0x15   :  { %573 = vmatpush3.bf16.msra.mxu0 %v570_v16  ;;  %605 = vmatpush3.bf16.msra.mxu1 %v570_v16 }
  0x16   :  { %575 = vmatprep.subr.bf16.mxu0 %v574_v19  ;;  %607 = vmatprep.subr.bf16.mxu1 %v574_v19 }
  0x19   :  { %577 = vmatpush3.bf16.msra.mxu0 %v574_v19  ;;  %609 = vmatpush3.bf16.msra.mxu1 %v574_v19 }
  0x1a   :  { %579 = vmatprep.subr.bf16.mxu0 %v578_v22  ;;  %611 = vmatprep.subr.bf16.mxu1 %v578_v22 }
  0x1d   :  { %581 = vmatpush3.bf16.msra.mxu0 %v578_v22  ;;  %613 = vmatpush3.bf16.msra.mxu1 %v578_v22 }
  0x1e   :  { %583 = vmatprep.subr.bf16.mxu0 %v582_v25  ;;  %615 = vmatprep.subr.bf16.mxu1 %v582_v25 }
  0x21   :  { %585 = vmatpush3.bf16.msra.mxu0 %v582_v25  ;;  %617 = vmatpush3.bf16.msra.mxu1 %v582_v25 }
  0x22   :  { %619 = vmatprep.subr.bf16.mxu0 %v618_v29  ;;  %627 = vmatprep.subr.bf16.mxu1 %v618_v29 }
  0x24   :  { %495 = vmatmul.mubr.f32.vlgmr.msra.gmra.mrb[0].mxu0 %v22_v28  ;;  %530 = vmatmul.mubr.f32.vlgmr.msra.gmra.mrb[0].mxu1 %v119_v32 }
  0x25   :  { %621 = vmatpush3.bf16.msra.mxu0 %v618_v29  ;;  %629 = vmatpush3.bf16.msra.mxu1 %v618_v29 }
  0x26   :  { %623 = vmatprep.subr.bf16.mxu0 %v622_v33  ;;  %631 = vmatprep.subr.bf16.mxu1 %v622_v33 }
  0x29   :  { %625 = vmatpush3.bf16.msra.mxu0 %v622_v33  ;;  %633 = vmatpush3.bf16.msra.mxu1 %v622_v33 }
  0xf7   :  { %v496_v34 = vpop.f32.mrb[0].mxu0  ;;  %v531_v35 = vpop.f32.mrb[0].mxu1 }
  0xf8   :  { %v196_v36 = vmul.f32 %v496_v34, %v496_v34  ;;  %v109_v37 = vpop.f32.mrb[1].mxu0  ;;  %v186_v38 = vpop.f32.mrb[1].mxu1 }
  0xf9   :  { %v195_v39 = vmul.f32 %v109_v37, %v109_v37  ;;  %540 = vmatprep.mubr.msk.f32.mxu0 %vm205_vm0, %v109_v37 }
  0xfa   :  { %v198_v40 = vsub.f32 %v531_v35, %v196_v36  ;;  %541 = vmatmul.mubr.msk.f32.vlgmr.msra.gmra.mrb[2].mxu0 %vm205_vm0, %v496_v34 }
  0xfb   :  { %v197_v41 = vsub.f32 %v186_v38, %v195_v39 }
  0xfc   :  { %v200_v42 = vmax.f32 %v198_v40, 0.0 }
  0xfd   :  { %v199_v43 = vmax.f32 %v197_v41, 0.0 }
  0xfe   :  { %v202_v44 = vadd.f32 1e-06, %v200_v42 }
  0xff   :  { %v201_v45 = vadd.f32 1e-06, %v199_v43 }
 0x101   :  { %637 = vrsqrt.f32 %v201_v45 }
 0x102   :  { %639 = vrsqrt.f32 %v202_v44 }
 0x10b   :  { %v638_v46 = vpop.eup %637 }
 0x10c   :  { %v640_v47 = vpop.eup %639  ;;  %551 = vmatprep.mubr.msk.f32.mxu1 %vm205_vm0, %v638_v46 }
 0x10d   :  { %552 = vmatmul.mubr.msk.f32.vlgmr.msra.gmra.mrb[2].mxu1 %vm205_vm0, %v640_v47 }
 0x1cd   :  { %v542_v48 = vpop.f32.mrb[2].mxu0 }
 0x1ce   :  { %v278_v49 = vpop.f32.mrb[3].mxu0  ;;  %v369_v52 = vsub.f32 %v22_v28, %v542_v48 }
 0x1cf   :  { %v368_v55 = vsub.f32 %v719_v9, %v278_v49 }
 0x1e0   :  { %v553_v51 = vpop.f32.mrb[2].mxu1 }
 0x1e1   :  { %v378_v53 = vmul.f32 %v553_v51, %v412_v50  ;;  %v359_v54 = vpop.f32.mrb[3].mxu1 }
 0x1e2   :  { %v377_v57 = vmul.f32 %v412_v50, %v359_v54 }
 0x1e3   :  { %v380_v58 = vmul.f32 %v378_v53, %v369_v52 }
 0x1e4   :  { %v379_v59 = vmul.f32 %v377_v57, %v368_v55 }
 0x1e5   :  { %v389_v60 = vadd.f32 %v413_v56, %v380_v58 }
 0x1e6   :  { %v388_v61 = vadd.f32 %v413_v56, %v379_v59 }
 0x1e7   :  { %391 = vst [vmem:[#allocation2 + $0x8] sm:$0xff] %v389_v60 }
 0x1e8   :  { %390 = vst [vmem:[#allocation2] sm:$0xff] %v388_v61 }
 0x1e9   :  { %652 = shalt.err (!%p649_p4)
}
 0x1ea   :  { %s653_s4 = scalar_lea.hbm %s797_s5, 256 }
 0x1eb   :  { %p654_p5 = scmp.ne.s32.totalorder %s797_s5, %s653_s4  ;;  %p657_p6 = scmp.lt.u32.totalorder %s653_s4, %s797_s5 }
 0x1ed   :  { %p659_p7 = pnand %p657_p6, %p654_p5 }
 0x1ef   :  { %662 = shalt.err (!%p659_p7)
}
 0x1f0   :  { %s666_s21 = smov 128   ;;  %s667_s22 = smov 8  }
 0x1f1   :  { %403 = dma.vmem_to_hbm [thread:$0]  %s398_s14, 256, %s797_s5, [#allocation3], %s666_s21, %s666_s21, %s667_s22  }
 0x1f2   :  { %663 = dma.done.wait [#allocation3], 256  }
 0x1f3   :  { %664 = vsyncadd [#allocation3], 4294967040 }
 0x1f4   :  { %407 = vsyncpa [#allocation3], 1 }

</bundles_post_ra>
